<compile_context>
chip_gen: v5e
topology: v5e:2x2
jax: 0.10.0
libtpu: 0.0.40
codegen_flags: <defaults>
</compile_context>

<pallas_src>
import functools
import math

import jax
import jax.numpy as jnp
from jax.experimental import pallas as pl
from jax.experimental.pallas import tpu as pltpu


def _arc_fc_kernel(flag_ref, label_ref, embed_ref, w_ref, out_ref, *,
                   s, cos_m, sin_m, is_pw, is_hard, mm, th, tn, nb):
    j = pl.program_id(0)          # class-tile index (outer, "parallel")
    b = pl.program_id(1)          # batch-tile index (inner, "arbitrary")

    w = w_ref[...]                # (tn, D), native (possibly bf16) dtype
    emb = embed_ref[...]          # (tb, D), already L2-normalized * s, w dtype

    # Raw logits on the MXU, contracting the shared last (lane) dim directly.
    # TODO(synk): if the Mosaic dump shows a vxpose of the weight tile for this
    # ((1,),(1,)) contraction, pass the weight pre-transposed as (D, C) HBM
    # layout with a (D, tn) block and contract (((1,),(0,)), ...) instead.
    raw = jax.lax.dot_general(
        emb, w,
        dimension_numbers=(((1,), (1,)), ((), ())),
        preferred_element_type=jnp.float32)               # (tb, tn)

    # Per-class inverse L2 norm in f32, computed from 128-lane-wide chunks of
    # the weight tile so no (tn, D) f32 copy is materialized; applied as a
    # (1, tn) output-column scale instead of rewriting the weight tile.
    D = w_ref.shape[1]
    chunk = 128 if (D % 128 == 0 and D > 128) else D
    n_chunks = D // chunk
    if n_chunks == 1:
        sl = w_ref[...].astype(jnp.float32)
        wss = jnp.sum(sl * sl, axis=1)                    # (tn,)
    else:
        def _sumsq(k, acc):
            off = pl.multiple_of(k * chunk, chunk)
            sl = w_ref[:, pl.ds(off, chunk)].astype(jnp.float32)
            return acc + jnp.sum(sl * sl, axis=1)
        wss = jax.lax.fori_loop(0, n_chunks, _sumsq,
                                jnp.zeros((tn,), jnp.float32),
                                unroll=n_chunks <= 8)
    # 1 / max(||w||, 1e-12) == rsqrt(max(||w||^2, 1e-24)).
    inv_wn = jax.lax.rsqrt(jnp.maximum(wss, 1e-24))       # (tn,)

    out_ref[...] = (raw * inv_wn[None, :]).astype(out_ref.dtype)

    # Margin correction only when at least one row of THIS batch tile has its
    # label inside THIS class tile.
    @pl.when(flag_ref[j * nb + b] != 0)
    def _():
        # Re-read the stored logits (f32 math) instead of keeping the full
        # (tb, tn) value live across the conditional.
        cur = out_ref[...].astype(jnp.float32)
        cols = jax.lax.broadcasted_iota(jnp.int32, cur.shape, 1) + j * tn
        onehot = (cols == label_ref[...]).astype(jnp.float32)       # (tb, tn)
        # Rows whose label is NOT in this tile take the score = 0 branch; the
        # resulting arc value is finite and is zeroed again by `onehot` below,
        # so the update is a no-op for them.  Keep this invariant.
        score = jnp.sum(cur * onehot, axis=1, keepdims=True)        # (tb, 1)
        cos_y = score * (1.0 / s)
        sin_y = jnp.sqrt(jnp.maximum(1.0 - cos_y * cos_y, 0.0))
        arc = s * (cos_y * cos_m - sin_y * sin_m)
        if is_pw:
            if not is_hard:
                arc = jnp.where(score > 0, arc, score)
            else:
                arc = jnp.where(score - th > 0, arc, score - s * mm)
        out_ref[...] = (cur + (arc - score) * onehot).astype(out_ref.dtype)


def arc_fully_connected(embed, weight, label, *, s, m, is_pw=True,
                        is_hard=False, tn=None, tb=None, out_dtype=None,
                        weight_buffers=2, vmem_limit_bytes=None):
    """Pallas implementation of ArcFullyConnected.forward.

    embed: (B, in_features), weight: (out_features, in_features), label: (B,)
    Returns (B, out_features) logits (dtype `out_dtype`, default embed.dtype)
    with the ArcFace margin applied at the label column.
    """
    B, D = embed.shape
    C, D2 = weight.shape
    assert D == D2
    assert s > 0 and 0 <= m < 0.5 * math.pi
    out_dtype = jnp.dtype(out_dtype) if out_dtype is not None else jnp.dtype(embed.dtype)

    # ---- class-tile size (prefer multiples of 256: fills the 2x256 MXU) ----
    if tn is None:
        if C % 1024 == 0:
            tn = 1024
        elif C % 512 == 0:
            tn = 512
        elif C % 256 == 0:
            tn = 256
        elif C <= 1024:
            tn = C                      # small head: one full-width tile
        else:
            tn = 512                    # pad C with zero-weight classes
    num_c_tiles = -(-C // tn)
    C_pad = num_c_tiles * tn
    assert tn == C_pad or tn % 128 == 0, \
        "class tile must be a multiple of 128 lanes or cover the whole head"

    # ---- batch-tile size (only needed to bound VMEM for very large B) ------
    if tb is None:
        tb = B
        if B > 512:
            for cand in (512, 256, 128, 64, 32, 16, 8):
                if B % cand == 0:
                    tb = cand
                    break
    assert B % tb == 0 and (tb == B or tb % 8 == 0)
    num_b_tiles = B // tb

    label = label.reshape(-1).astype(jnp.int32)
    label2d = label.reshape(B, 1)

    # Hoisted embedding normalization (one small XLA op over (B, D), f32 math),
    # scaled by s and cast ONCE to the matmul input dtype (= weight dtype).
    emb_f32 = embed.astype(jnp.float32)
    inv_en = jax.lax.rsqrt(
        jnp.maximum(jnp.sum(emb_f32 * emb_f32, axis=1, keepdims=True), 1e-24))
    n_embed = (emb_f32 * inv_en * float(s)).astype(weight.dtype)

    w = weight
    if C_pad != C:
        # Padded classes have zero weight -> zero logits; sliced off below.
        w = jnp.concatenate([w, jnp.zeros((C_pad - C, D), weight.dtype)], axis=0)

    # Per-(class-tile, batch-tile) "contains at least one label" bitmap,
    # flattened to 1-D so it stays tiny in SMEM.
    flat_idx = (label // tn) * num_b_tiles + jnp.arange(B, dtype=jnp.int32) // tb
    flags = jnp.zeros((num_c_tiles * num_b_tiles,), jnp.int32).at[flat_idx].set(1)

    kernel = functools.partial(
        _arc_fc_kernel,
        s=float(s), cos_m=math.cos(m), sin_m=math.sin(m),
        is_pw=is_pw, is_hard=is_hard,
        mm=math.sin(math.pi - m) * m, th=math.cos(math.pi - m),
        tn=tn, nb=num_b_tiles)

    # Optional deeper buffering of the (only) streaming input: hides DMA
    # issue/latency jitter behind the short per-tile compute (costs one extra
    # tn*D VMEM tile).  Left opt-in (default double-buffering).
    w_spec_kwargs = {}
    if weight_buffers is not None and weight_buffers > 2:
        w_spec_kwargs["pipeline_mode"] = pl.Buffered(weight_buffers)
    w_spec = pl.BlockSpec((tn, D), lambda j, b, flags: (j, 0), **w_spec_kwargs)

    in_specs = [
        pl.BlockSpec((tb, 1), lambda j, b, flags: (b, 0)),   # labels (rarely used)
        pl.BlockSpec((tb, D), lambda j, b, flags: (b, 0)),   # normalized embed
        w_spec,                                              # streamed weight tile
    ]
    out_spec = pl.BlockSpec((tb, tn), lambda j, b, flags: (b, j))

    cost = pl.CostEstimate(
        flops=int(2 * B * C_pad * D),
        transcendentals=int(C_pad * num_b_tiles + B),
        bytes_accessed=int(C_pad * D * jnp.dtype(weight.dtype).itemsize
                           + num_c_tiles * B * D * jnp.dtype(n_embed.dtype).itemsize
                           + B * C_pad * out_dtype.itemsize
                           + B * 4))

    compiler_kwargs = dict(dimension_semantics=("parallel", "arbitrary"))
    if vmem_limit_bytes is not None:
        # Needed on v5e (16 MiB default scoped VMEM) for tn >= 1024 / large tb.
        compiler_kwargs["vmem_limit_bytes"] = vmem_limit_bytes

    out = pl.pallas_call(
        kernel,
        out_shape=jax.ShapeDtypeStruct((B, C_pad), out_dtype),
        grid_spec=pltpu.PrefetchScalarGridSpec(
            num_scalar_prefetch=1,                 # flags -> SMEM
            # Class tiles outer ("parallel"), batch tiles innermost so the
            # weight block index is constant across batch steps (no re-DMA of
            # the dominant weight stream) while VMEM stays bounded.
            grid=(num_c_tiles, num_b_tiles),
            in_specs=in_specs,
            out_specs=out_spec),
        compiler_params=pltpu.CompilerParams(**compiler_kwargs),
        cost_estimate=cost,
    )(flags, label2d, n_embed, w)

    if C_pad != C:
        out = out[:, :C]
    return out


def _reference(embed, weight, label, *, s, m, is_pw=True, is_hard=False):
    """Pure-JAX reference mirroring the PyTorch forward."""
    n_w = weight / jnp.maximum(
        jnp.linalg.norm(weight, axis=1, keepdims=True), 1e-12)
    n_e = embed / jnp.maximum(
        jnp.linalg.norm(embed, axis=1, keepdims=True), 1e-12) * s
    out = n_e @ n_w.T
    score = jnp.take_along_axis(out, label[:, None], axis=1)
    cos_y = score / s
    sin_y = jnp.sqrt(jnp.maximum(1.0 - cos_y ** 2, 0.0))
    arc = s * (cos_y * math.cos(m) - sin_y * math.sin(m))
    if is_pw:
        if not is_hard:
            arc = jnp.where(score > 0, arc, score)
        else:
            mm = math.sin(math.pi - m) * m
            th = math.cos(math.pi - m)
            arc = jnp.where(score - th > 0, arc, score - s * mm)
    one_hot = jax.nn.one_hot(label, out.shape[1], dtype=out.dtype)
    return out + (arc - score) * one_hot


if __name__ == "__main__":
    s_, m_ = 64.0, 0.5
    key = jax.random.PRNGKey(0)
    keys = jax.random.split(key, 8)

    def _make(kw, ke, kl, B, Din, C):
        stdv = 1.0 / math.sqrt(Din)
        w = jax.random.uniform(kw, (C, Din), jnp.float32, -stdv, stdv)
        e = jax.random.normal(ke, (B, Din), jnp.float32)
        l = jax.random.randint(kl, (B,), 0, C, jnp.int32)
        return w, e, l

    # --- Case 1: multiple class tiles (tn=128), soft margin path ------------
    B, Din, C = 8, 32, 256
    w1, e1, l1 = _make(keys[0], keys[1], keys[2], B, Din, C)
    out = jax.block_until_ready(
        arc_fully_connected(e1, w1, l1, s=s_, m=m_, tn=128))
    ref = _reference(e1, w1, l1, s=s_, m=m_)
    assert out.shape == (B, C)
    assert jnp.allclose(out, ref, atol=1e-3, rtol=1e-4), "mismatch (soft path)"

    # --- Case 2: hard margin path -------------------------------------------
    out_h = jax.block_until_ready(
        arc_fully_connected(e1, w1, l1, s=s_, m=m_, is_hard=True, tn=128))
    ref_h = _reference(e1, w1, l1, s=s_, m=m_, is_hard=True)
    assert jnp.allclose(out_h, ref_h, atol=1e-3, rtol=1e-4), "mismatch (hard path)"

    # --- Case 3: batch-tiled grid + chunked weight-norm path (D=256) --------
    B3, Din3, C3 = 16, 256, 256
    w3, e3, l3 = _make(keys[3], keys[4], keys[5], B3, Din3, C3)
    out3 = jax.block_until_ready(
        arc_fully_connected(e3, w3, l3, s=s_, m=m_, tn=128, tb=8))
    ref3 = _reference(e3, w3, l3, s=s_, m=m_)
    assert out3.shape == (B3, C3)
    assert jnp.allclose(out3, ref3, atol=1e-3, rtol=1e-4), "mismatch (batch-tiled)"

    # --- Case 4: non-divisible head -> zero-padded class tiles, is_pw=False --
    C4 = 200
    w4, e4, l4 = _make(keys[6], keys[1], keys[7], B, Din, C4)
    out4 = jax.block_until_ready(
        arc_fully_connected(e4, w4, l4, s=s_, m=m_, is_pw=False, tn=128))
    ref4 = _reference(e4, w4, l4, s=s_, m=m_, is_pw=False)
    assert out4.shape == (B, C4)
    assert jnp.allclose(out4, ref4, atol=1e-3, rtol=1e-4), "mismatch (padded head)"

    # --- Case 5: bf16 output (halved output HBM traffic), loose tolerance ---
    out5 = jax.block_until_ready(
        arc_fully_connected(e1, w1, l1, s=s_, m=m_, tn=128,
                            out_dtype=jnp.bfloat16))
    assert out5.dtype == jnp.bfloat16
    assert jnp.allclose(out5.astype(jnp.float32), ref, atol=1.0, rtol=2e-2), \
        "mismatch (bf16 output)"

    print("KERNEL_OK")
</pallas_src>

<mosaic_0001>
module attributes {stable_mosaic.version = 11 : i64} {
  func.func @_arc_fc_kernel(%arg0: i32, %arg1: i32, %arg2: memref<2xi32, #tpu.memory_space<smem>>, %arg3: memref<8x1xi32, #tpu.memory_space<vmem>>, %arg4: memref<8x32xf32, #tpu.memory_space<vmem>>, %arg5: memref<128x32xf32, #tpu.memory_space<vmem>>, %arg6: memref<8x128xf32, #tpu.memory_space<vmem>>) attributes {dimension_semantics = [#tpu.dimension_semantics<parallel>, #tpu.dimension_semantics<arbitrary>], iteration_bounds = array<i64: 2, 1>, scalar_prefetch = 1 : i64, scratch_operands = 0 : i64, tpu.core_type = #tpu.core_type<tc>, window_params = [{transform_indices = @transform_0, window_bounds = array<i64: 8, 1>}, {transform_indices = @transform_1, window_bounds = array<i64: 8, 32>}, {transform_indices = @transform_2, window_bounds = array<i64: 128, 32>}, {transform_indices = @transform_3, window_bounds = array<i64: 8, 128>}]} {
    %c0 = arith.constant 0 : index
    %c0_0 = arith.constant 0 : index
    %0 = vector.load %arg5[%c0, %c0_0] : memref<128x32xf32, #tpu.memory_space<vmem>>, vector<128x32xf32>
    %c0_1 = arith.constant 0 : index
    %c0_2 = arith.constant 0 : index
    %1 = vector.load %arg4[%c0_1, %c0_2] : memref<8x32xf32, #tpu.memory_space<vmem>>, vector<8x32xf32>
    %cst = arith.constant dense<0.000000e+00> : vector<8x128xf32>
    %2 = tpu.matmul %1, %0, %cst {dimension_numbers = #tpu.dot_dimension_numbers<[1], [1], [0], [0], [0, 0, 1, 0], [], []>} : vector<8x32xf32>, vector<128x32xf32>, vector<8x128xf32> -> vector<8x128xf32>
    %c0_3 = arith.constant 0 : index
    %c0_4 = arith.constant 0 : index
    %3 = vector.load %arg5[%c0_3, %c0_4] : memref<128x32xf32, #tpu.memory_space<vmem>>, vector<128x32xf32>
    %4 = arith.mulf %3, %3 : vector<128x32xf32>
    %cst_5 = arith.constant dense<0.000000e+00> : vector<128xf32>
    %5 = vector.multi_reduction <add>, %4, %cst_5 [1] : vector<128x32xf32> to vector<128xf32>
    %cst_6 = arith.constant 1.000000e-24 : f32
    %6 = vector.broadcast %cst_6 : f32 to vector<128xf32>
    %7 = arith.maximumf %5, %6 : vector<128xf32>
    %8 = math.rsqrt %7 : vector<128xf32>
    %9 = vector.shape_cast %8 : vector<128xf32> to vector<1x128xf32>
    %10 = vector.broadcast %9 : vector<1x128xf32> to vector<8x128xf32>
    %11 = arith.mulf %2, %10 : vector<8x128xf32>
    %c0_7 = arith.constant 0 : index
    %c0_8 = arith.constant 0 : index
    %12 = vector.load %arg6[%c0_7, %c0_8] : memref<8x128xf32, #tpu.memory_space<vmem>>, vector<8x128xf32>
    tpu.vector_store %arg6[%c0_7, %c0_8], %11 {strides = array<i32>} : memref<8x128xf32, #tpu.memory_space<vmem>>, vector<8x128xf32>,
    %c1_i32 = arith.constant 1 : i32
    %13 = arith.muli %arg0, %c1_i32 : i32
    %14 = arith.addi %13, %arg1 : i32
    %15 = arith.index_cast %14 : i32 to index
    %16 = memref.load %arg2[%15] : memref<2xi32, #tpu.memory_space<smem>>
    %c0_i32 = arith.constant 0 : i32
    %17 = arith.cmpi ne, %16, %c0_i32 : i32
    %18 = arith.extui %17 : i1 to i32
    %c0_i32_9 = arith.constant 0 : i32
    %19 = arith.cmpi ne, %18, %c0_i32_9 : i32
    scf.if %19 {
      %c0_10 = arith.constant 0 : index
      %c0_11 = arith.constant 0 : index
      %20 = vector.load %arg6[%c0_10, %c0_11] : memref<8x128xf32, #tpu.memory_space<vmem>>, vector<8x128xf32>
      %21 = tpu.iota {dimensions = array<i32: 1>} : vector<8x128xi32>
      %c128_i32 = arith.constant 128 : i32
      %22 = arith.muli %arg0, %c128_i32 : i32
      %23 = vector.broadcast %22 : i32 to vector<8x128xi32>
      %24 = arith.addi %21, %23 : vector<8x128xi32>
      %c0_12 = arith.constant 0 : index
      %c0_13 = arith.constant 0 : index
      %25 = vector.load %arg3[%c0_12, %c0_13] : memref<8x1xi32, #tpu.memory_space<vmem>>, vector<8x1xi32>
      %26 = vector.broadcast %25 : vector<8x1xi32> to vector<8x128xi32>
      %27 = arith.cmpi eq, %24, %26 : vector<8x128xi32>
      %28 = arith.extui %27 : vector<8x128xi1> to vector<8x128xi32>
      %29 = arith.sitofp %28 : vector<8x128xi32> to vector<8x128xf32>
      %30 = arith.mulf %20, %29 : vector<8x128xf32>
      %cst_14 = arith.constant dense<0.000000e+00> : vector<8xf32>
      %31 = vector.multi_reduction <add>, %30, %cst_14 [1] : vector<8x128xf32> to vector<8xf32>
      %32 = vector.shape_cast %31 : vector<8xf32> to vector<8x1xf32>
      %cst_15 = arith.constant 1.562500e-02 : f32
      %33 = vector.broadcast %cst_15 : f32 to vector<8x1xf32>
      %34 = arith.mulf %32, %33 : vector<8x1xf32>
      %35 = arith.mulf %34, %34 : vector<8x1xf32>
      %cst_16 = arith.constant 1.000000e+00 : f32
      %36 = vector.broadcast %cst_16 : f32 to vector<8x1xf32>
      %37 = arith.subf %36, %35 : vector<8x1xf32>
      %cst_17 = arith.constant 0.000000e+00 : f32
      %38 = vector.broadcast %cst_17 : f32 to vector<8x1xf32>
      %39 = arith.maximumf %37, %38 : vector<8x1xf32>
      %40 = math.sqrt %39 : vector<8x1xf32>
      %cst_18 = arith.constant 0.87758255 : f32
      %41 = vector.broadcast %cst_18 : f32 to vector<8x1xf32>
      %42 = arith.mulf %34, %41 : vector<8x1xf32>
      %cst_19 = arith.constant 0.47942555 : f32
      %43 = vector.broadcast %cst_19 : f32 to vector<8x1xf32>
      %44 = arith.mulf %40, %43 : vector<8x1xf32>
      %45 = arith.subf %42, %44 : vector<8x1xf32>
      %cst_20 = arith.constant 6.400000e+01 : f32
      %46 = vector.broadcast %cst_20 : f32 to vector<8x1xf32>
      %47 = arith.mulf %46, %45 : vector<8x1xf32>
      %cst_21 = arith.constant 0.000000e+00 : f32
      %48 = vector.broadcast %cst_21 : f32 to vector<8x1xf32>
      %49 = arith.cmpf ogt, %32, %48 : vector<8x1xf32>
      %50 = arith.select %49, %47, %32 : vector<8x1xi1>, vector<8x1xf32>
      %51 = arith.subf %50, %32 : vector<8x1xf32>
      %52 = vector.broadcast %51 : vector<8x1xf32> to vector<8x128xf32>
      %53 = arith.mulf %52, %29 : vector<8x128xf32>
      %54 = arith.addf %20, %53 : vector<8x128xf32>
      %c0_22 = arith.constant 0 : index
      %c0_23 = arith.constant 0 : index
      %55 = vector.load %arg6[%c0_22, %c0_23] : memref<8x128xf32, #tpu.memory_space<vmem>>, vector<8x128xf32>
      tpu.vector_store %arg6[%c0_22, %c0_23], %54 {strides = array<i32>} : memref<8x128xf32, #tpu.memory_space<vmem>>, vector<8x128xf32>,
    } else {
    }
    return
  }
  func.func @transform_0(%arg0: i32, %arg1: i32, %arg2: memref<2xi32, #tpu.memory_space<smem>>) -> (i32, i32) {
    %c0_i32 = arith.constant 0 : i32
    %c0_i32_0 = arith.constant 0 : i32
    return %arg1, %c0_i32 : i32, i32
  }
  func.func @transform_1(%arg0: i32, %arg1: i32, %arg2: memref<2xi32, #tpu.memory_space<smem>>) -> (i32, i32) {
    %c0_i32 = arith.constant 0 : i32
    %c0_i32_0 = arith.constant 0 : i32
    return %arg1, %c0_i32 : i32, i32
  }
  func.func @transform_2(%arg0: i32, %arg1: i32, %arg2: memref<2xi32, #tpu.memory_space<smem>>) -> (i32, i32) {
    %c0_i32 = arith.constant 0 : i32
    %c0_i32_0 = arith.constant 0 : i32
    return %arg0, %c0_i32 : i32, i32
  }
  func.func @transform_3(%arg0: i32, %arg1: i32, %arg2: memref<2xi32, #tpu.memory_space<smem>>) -> (i32, i32) {
    %c0_i32 = arith.constant 0 : i32
    return %arg1, %arg0 : i32, i32
  }
}

</mosaic_0001>

<bundles_post_ra>
// kernel: tpu_custom_call.1
= control target key start
LH: loop header
LB: loop body
LE: loop exit
PB: predicated region body
PF: predicated region fallthrough
CT: control target
= control target key end

     0   :  { %s1035_s18 = smov [#allocation3]   ;;  %s1635_s0 = inlined_call_operand.vmem [shape: s32[2], index: 0, kind: input, shape index: {}]   ;;  %s1636_s1 = inlined_call_operand.vmem [shape: s32[8,1], index: 1, kind: input, shape index: {}]   ;;  %s1637_s2 = inlined_call_operand.vmem [shape: f32[8,32], index: 2, kind: input, shape index: {}]   ;;  %s1638_s3 = inlined_call_operand.vmem [shape: f32[256,32], index: 3, kind: input, shape index: {}]   ;;  %s1639_s4 = inlined_call_operand.hbm [shape: f32[8,256], index: 4, kind: output, shape index: {}]  }
   0x1   :  { %s10_s17 = sshll.u32 %s1635_s0, 4  ;;  %s11_s17 = int_to_ptr.vmem [resolvable:$true] %s10_s17 }
   0x2   :  { %13 = dma.vmem_to_smem %s11_s17, 16, %s1035_s18, [#allocation2] }
   0x3   :  { %1005 = dma.done.wait [#allocation2], 16 }
   0x4   :  { %1006 = vsyncadd [#allocation2], 4294967280 }
   0x5   :  { %16 = sfence }
   0x6   :  { %17 = vsyncpa [#allocation5], 0 }
   0x7   :  { %19 = vsyncpa [#allocation5 + $0x1], 0  ;;  %s1066_s19 = smov 0   ;;  %s1068_s20 = smov 0  }
   0x8   :  { %s1070_s21 = smov 0   ;;  %s1072_s22 = smov 0  }
   0x9   :  { %s1074_s23 = smov 0   ;;  %s1076_s24 = smov 0  }
   0xa LB: > { %s814_s0 = sadd.s32 4294967295, %s1033_s24   ;;  %s815_s25 = sadd.s32 4294967294, %s1033_s24   ;;  %s1033_s24 = sphi %s1076_s24, %s25_s24   ;;  %s1029_s23 = sphi %s1074_s23, %s1670_s23   ;;  %s1025_s22 = sphi %s1072_s22, %s1669_s22   ;;  %s1021_s21 = sphi %s1070_s21, %s1668_s21   ;;  %s1017_s20 = sphi %s1068_s20, %s1667_s20   ;;  %s1013_s19 = sphi %s1066_s19, %s1666_s19  }
   0xb   : > { %s37_s26 = sadd.s32 1, %s1029_s23  ;;  %s124_s27 = sadd.s32 1, %s1021_s21 }
   0xc   : > { %p39_p0 = scmp.ge.s32.totalorder %s37_s26, 2  ;;  %p134_p1 = scmp.ne.s32.totalorder %s1021_s21, %s1017_s20 }
   0xd   : > { %p135_p2 = scmp.eq.s32.totalorder %s814_s0, 1  ;;  %p140_p3 = scmp.ne.s32.totalorder %s1017_s20, %s1013_s19 }
   0xe   : > { %s1672_s26 = smov (%p39_p0, %s37_s26), 0  ;;  %p141_p5 = scmp.eq.s32.totalorder %s815_s25, 1 }
   0xf   : > { %p1106_p4 = por %p135_p2, %p134_p1  ;;  %s120_s29 = ssub.s32 %s1029_s23, %s1672_s26 }
  0x10   : > { %p820_p6 = scmp.ge.s32.totalorder %s1033_s24, 1  ;;  %p122_p7 = scmp.eq.s32.totalorder %s120_s29, 0 }
  0x11   : > { %p1113_p8 = por %p141_p5, %p140_p3  ;;  %p182_p9 = scmp.lt.s32.totalorder %s1033_s24, 3 }
  0x12   : > { %s1119_s5 = scalar_select %p122_p7, %s1021_s21, %s124_s27  }
  0x13   : > { %p183_p10 = pnand %p820_p6, %p182_p9 }
  0x14   : > { %s822_s6 = sshll.u32 (!%p183_p10), %s1025_s22, 4  ;;  %s1215_s13 = sld [smem:[#allocation3 + %s1025_s22]] (!%p183_p10) }
  0x15   : > { %186 = sbr.rel (%p183_p10) target bundleno = 517 (0x205), region = 32  ;;  %p223_p11 = scmp.lt.s32.totalorder (!%p183_p10), %s822_s6, 31 }
  0x16   : > { %s211_s14 = sand.u32 (!%p183_p10), 1, %s1017_s20  }
  0x17   : > { %s821_s15 = sshll.u32 (!%p183_p10), %s211_s14, 3 }
  0x18   : > { %s1585_s16 = scalar_lea.vmem (!%p183_p10), [#allocation4], %s821_s15 }
  0x1a   : > { %s1674_s6 = smov (!%p223_p11, %s822_s6), 31  ;;  %vm245_vm0 = vcmask 261120   ;;  %v244_v48 = vld [vmem:[%s1637_s2] sm:$0xff]  ;;  %v573_v58 = vlaneseq  ;;  %vm578_vm7 = vcmask 130112   ;;  %vm582_vm12 = vcmask 195712   ;;  %p841_p12 = scmp.eq.s32.totalorder %s1215_s13, 0 }
  0x1b   : > { %s823_s7 = sshll.u32 %s1674_s6, 3  ;;  %s842_s0 = sshll.u32 (!%p841_p12), %s1025_s22, 7 }
  0x1c   : > { %s1125_s10 = scalar_lea.vmem %s1638_s3, %s823_s7 }
  0x1d   : > { %v1128_v0 = vld [vmem:[%s1125_s10 + $0x78] sm:$0xff]  ;;  %v1131_v1 = vld [vmem:[%s1125_s10 + $0x20] sm:$0xff]  ;;  %v1134_v2 = vld [vmem:[%s1125_s10 + $0x10] sm:$0xff] }
  0x1e   : > { %824 = vmatpush.xpose.msk.msra.mxu0 %vm245_vm0, %v1128_v0  ;;  %v321_v3 = vmul.f32 %v1131_v1, %v1131_v1  ;;  %v319_v4 = vmul.f32 %v1134_v2, %v1134_v2  ;;  %v1143_v5 = vld [vmem:[%s1125_s10] sm:$0xff]  ;;  %v242_v7 = vld [vmem:[%s1125_s10 + $0x70] sm:$0xff]  ;;  %v1149_v8 = vld [vmem:[%s1125_s10 + $0x28] sm:$0xff]  ;;  %v332_v46 = vmul.f32 %v1128_v0, %v1128_v0 }
  0x1f   : > { %v317_v6 = vmul.f32 %v1143_v5, %v1143_v5  ;;  %v1152_v9 = vld [vmem:[%s1125_s10 + $0x18] sm:$0xff]  ;;  %v1157_v12 = vld [vmem:[%s1125_s10 + $0x8] sm:$0xff]  ;;  %v322_v14 = vmul.f32 %v1149_v8, %v1149_v8  ;;  %v240_v21 = vld [vmem:[%s1125_s10 + $0x60] sm:$0xff]  ;;  %v331_v40 = vmul.f32 %v242_v7, %v242_v7 }
  0x20   : > { %v345_v10 = vsel %vm245_vm0, %v321_v3, 0.0  ;;  %v339_v11 = vsel %vm245_vm0, %v319_v4, 0.0  ;;  %v320_v15 = vmul.f32 %v1152_v9, %v1152_v9  ;;  %v241_v16 = vld [vmem:[%s1125_s10 + $0x68] sm:$0xff]  ;;  %v318_v17 = vmul.f32 %v1157_v12, %v1157_v12  ;;  %v236_v22 = vld [vmem:[%s1125_s10 + $0x40] sm:$0xff]  ;;  %v235_v23 = vld [vmem:[%s1125_s10 + $0x38] sm:$0xff] }
  0x21   : > { %346 = vadd.xlane.f32.xlu2 %v345_v10  ;;  %340 = vadd.xlane.f32.xlu1 %v339_v11  ;;  %v333_v13 = vsel %vm245_vm0, %v317_v6, 0.0  ;;  %v348_v18 = vsel %vm245_vm0, %v322_v14, 0.0  ;;  %v234_v24 = vld [vmem:[%s1125_s10 + $0x30] sm:$0xff]  ;;  %v325_v25 = vmul.f32 %v236_v22, %v236_v22  ;;  %v324_v26 = vmul.f32 %v235_v23, %v235_v23  ;;  %v239_v27 = vld [vmem:[%s1125_s10 + $0x58] sm:$0xff]  ;;  %v237_v33 = vld [vmem:[%s1125_s10 + $0x48] sm:$0xff] }
  0x22   : > { %334 = vadd.xlane.f32.xlu0 %v333_v13  ;;  %825 = vmatpush.xpose.msk.msra.mxu0 %vm245_vm0, %v242_v7  ;;  %v342_v19 = vsel %vm245_vm0, %v320_v15, 0.0  ;;  %v336_v20 = vsel %vm245_vm0, %v318_v17, 0.0  ;;  %v323_v28 = vmul.f32 %v234_v24, %v234_v24  ;;  %v238_v32 = vld [vmem:[%s1125_s10 + $0x50] sm:$0xff]  ;;  %v328_v34 = vmul.f32 %v239_v27, %v239_v27 }
  0x23   : > { %v357_v29 = vsel %vm245_vm0, %v325_v25, 0.0  ;;  %v354_v30 = vsel %vm245_vm0, %v324_v26, 0.0  ;;  %v327_v35 = vmul.f32 %v238_v32, %v238_v32  ;;  %v326_v36 = vmul.f32 %v237_v33, %v237_v33 }
  0x24   : > { %v351_v31 = vsel %vm245_vm0, %v323_v28, 0.0  ;;  %v366_v37 = vsel %vm245_vm0, %v328_v34, 0.0  ;;  %v330_v41 = vmul.f32 %v241_v16, %v241_v16  ;;  %v329_v42 = vmul.f32 %v240_v21, %v240_v21 }
  0x25   : > { %v363_v38 = vsel %vm245_vm0, %v327_v35, 0.0  ;;  %v360_v39 = vsel %vm245_vm0, %v326_v36, 0.0  ;;  %v375_v43 = vsel %vm245_vm0, %v331_v40, 0.0  ;;  %v378_v47 = vsel %vm245_vm0, %v332_v46, 0.0 }
  0x26   : > { %826 = vmatpush.xpose.msk.msra.mxu0 %vm245_vm0, %v241_v16  ;;  %v372_v44 = vsel %vm245_vm0, %v330_v41, 0.0  ;;  %v369_v45 = vsel %vm245_vm0, %v329_v42, 0.0  ;;  %v1246_v4 = vand.u32 127, %v573_v58 }
  0x28   : > { %v1255_v11 = vadd.s32 4294967264, %v1246_v4  ;;  %v576_v25 = vadd.s32 4294967288, %v1246_v4  ;;  %v1287_v28 = vadd.s32 4294967232, %v1246_v4 }
  0x29   : > { %349 = vadd.xlane.f32.xlu2 %v348_v18  ;;  %343 = vadd.xlane.f32.xlu1 %v342_v19  ;;  %v1265_v18 = vadd.s32 4294967256, %v1246_v4  ;;  %v1268_v19 = vadd.s32 4294967272, %v1246_v4 }
  0x2a   : > { %337 = vadd.xlane.f32.xlu0 %v336_v20  ;;  %827 = vmatpush.xpose.msk.msra.mxu0 %vm245_vm0, %v240_v21 }
  0x2e   : > { %828 = vmatpush.xpose.msk.msra.mxu0 %vm245_vm0, %v239_v27 }
  0x31   : > { %358 = vadd.xlane.f32.xlu2 %v357_v29  ;;  %355 = vadd.xlane.f32.xlu1 %v354_v30 }
  0x32   : > { %352 = vadd.xlane.f32.xlu0 %v351_v31  ;;  %829 = vmatpush.xpose.msk.msra.mxu0 %vm245_vm0, %v238_v32  ;;  %v1291_v32 = vadd.s32 4294967240, %v1246_v4 }
  0x36   : > { %830 = vmatpush.xpose.msk.msra.mxu0 %vm245_vm0, %v237_v33 }
  0x39   : > { %367 = vadd.xlane.f32.xlu2 %v366_v37  ;;  %364 = vadd.xlane.f32.xlu1 %v363_v38 }
  0x3a   : > { %361 = vadd.xlane.f32.xlu0 %v360_v39  ;;  %831 = vmatpush.xpose.msk.msra.mxu0 %vm245_vm0, %v236_v22 }
  0x3e   : > { %832 = vmatpush.xpose.msk.msra.mxu0 %vm245_vm0, %v235_v23 }
  0x41   : > { %376 = vadd.xlane.f32.xlu2 %v375_v43  ;;  %373 = vadd.xlane.f32.xlu1 %v372_v44 }
  0x42   : > { %370 = vadd.xlane.f32.xlu0 %v369_v45  ;;  %833 = vmatpush.xpose.msk.msra.mxu0 %vm245_vm0, %v234_v24 }
  0x46   : > { %834 = vmatpush.xpose.msk.msra.mxu0 %vm245_vm0, %v1149_v8 }
  0x4a   : > { %379 = vadd.xlane.f32.xlu0 %v378_v47  ;;  %835 = vmatpush.xpose.msk.msra.mxu0 %vm245_vm0, %v1131_v1 }
  0x4e   : > { %836 = vmatpush.xpose.msk.msra.mxu0 %vm245_vm0, %v1152_v9 }
  0x52   : > { %837 = vmatpush.xpose.msk.msra.mxu0 %vm245_vm0, %v1134_v2 }
  0x56   : > { %838 = vmatpush.xpose.msk.msra.mxu0 %vm245_vm0, %v1157_v12  ;;  %v1258_v12 = vadd.s32 4294967280, %v1246_v4 }
  0x5a   : > { %839 = vmatpush.xpose.msk.msra.mxu0 %vm245_vm0, %v1143_v5 }
  0x5d   : > { %840 = vmatmul.msk.f32.vlgmr.msra.gmra.mxu0 %vm245_vm0, %v244_v48 }
  0x94   : > { %v347_v49 = vpop.xlane.xlu2 %346  ;;  %v341_v50 = vpop.xlane.xlu1 %340 }
  0x95   : > { %v1217_v51 = vmax.f32 %v347_v49, 1e-24  ;;  %v1219_v52 = vmax.f32 %v341_v50, 1e-24  ;;  %v335_v53 = vpop.xlane.xlu0 %334 }
  0x96   : > { %v1221_v54 = vmax.f32 %v335_v53, 1e-24 }
  0x97   : > { %906 = vrsqrt.f32 %v1217_v51  ;;  %vm443_vm1 = vweird.f32 %v1217_v51  ;;  %vm423_vm2 = vweird.f32 %v1219_v52 }
  0x98   : > { %908 = vrsqrt.f32 %v1219_v52  ;;  %vm403_vm3 = vweird.f32 %v1221_v54 }
  0x99   : > { %910 = vrsqrt.f32 %v1221_v54 }
  0x9c   : > { %v350_v55 = vpop.xlane.xlu2 %349  ;;  %v344_v56 = vpop.xlane.xlu1 %343 }
  0x9d   : > { %v1226_v57 = vpop.eup %906  ;;  %v1228_v59 = vmax.f32 %v350_v55, 1e-24  ;;  %v1230_v60 = vmax.f32 %v344_v56, 1e-24  ;;  %v338_v61 = vpop.xlane.xlu0 %337  ;;  %v1332_v56 = vadd.s32 4294967248, %v1246_v4 }
  0x9e   : > { %v1232_v62 = vpop.eup %908  ;;  %v438_v63 = vmul.f32 %v1226_v57, %v1217_v51  ;;  %v1236_v0 = vmax.f32 %v338_v61, 1e-24  ;;  %vm444_vm4 = vweird.f32 %v1226_v57 }
  0x9f   : > { %v1238_v1 = vpop.eup %910  ;;  %v418_v2 = vmul.f32 %v1232_v62, %v1219_v52  ;;  %912 = vrsqrt.f32 %v1228_v59  ;;  %vm424_vm5 = vweird.f32 %v1232_v62  ;;  %vm1314_vm10 = vmor %vm443_vm1, %vm444_vm4  ;;  %vm453_vm13 = vweird.f32 %v1228_v59 }
  0xa0   : > { %v398_v3 = vmul.f32 %v1238_v1, %v1221_v54  ;;  %914 = vrsqrt.f32 %v1230_v60  ;;  %v439_v5 = vmul.f32 %v1226_v57, %v438_v63  ;;  %vm404_vm6 = vweird.f32 %v1238_v1  ;;  %vm1326_vm11 = vmor %vm423_vm2, %vm424_vm5 }
  0xa1   : > { %916 = vrsqrt.f32 %v1236_v0  ;;  %v419_v6 = vmul.f32 %v1232_v62, %v418_v2  ;;  %vm413_vm8 = vweird.f32 %v1236_v0  ;;  %vm433_vm14 = vweird.f32 %v1230_v60  ;;  %vm1358_vm1 = vmor %vm403_vm3, %vm404_vm6 }
  0xa2   : > { %v399_v7 = vmul.f32 %v1238_v1, %v398_v3  ;;  %v440_v16 = vmul.f32 0.5, %v439_v5  ;;  %v1345_v52 = vadd.s32 4294967208, %v1246_v4  ;;  %vm586_vm2 = vcmask 261312  }
  0xa3   : > { %v420_v17 = vmul.f32 0.5, %v419_v6  ;;  %vm590_vm5 = vcmask 326912  }
  0xa4   : > { %v359_v8 = vpop.xlane.xlu2 %358  ;;  %v356_v9 = vpop.xlane.xlu1 %355  ;;  %v400_v21 = vmul.f32 0.5, %v399_v7  ;;  %v441_v29 = vsub.f32 1.5, %v440_v16 }
  0xa5   : > { %v1252_v10 = vpop.eup %912  ;;  %v1260_v13 = vmax.f32 %v359_v8, 1e-24  ;;  %v353_v14 = vpop.xlane.xlu0 %352  ;;  %v1275_v23 = vmax.f32 %v356_v9, 1e-24  ;;  %v421_v30 = vsub.f32 1.5, %v420_v17  ;;  %v1374_v9 = vadd.s32 4294967216, %v1246_v4 }
  0xa6   : > { %v1262_v15 = vpop.eup %914  ;;  %v448_v24 = vmul.f32 %v1252_v10, %v1228_v59  ;;  %v401_v33 = vsub.f32 1.5, %v400_v21  ;;  %v1297_v37 = vmax.f32 %v353_v14, 1e-24  ;;  %v442_v44 = vmul.f32 %v1226_v57, %v441_v29 }
  0xa7   : > { %v1270_v20 = vpop.eup %916  ;;  %v428_v22 = vmul.f32 %v1262_v15, %v1230_v60  ;;  %918 = vrsqrt.f32 %v1260_v13  ;;  %v422_v45 = vmul.f32 %v1232_v62, %v421_v30  ;;  %vm434_vm15 = vweird.f32 %v1262_v15 }
  0xa8   : > { %v408_v26 = vmul.f32 %v1270_v20, %v1236_v0  ;;  %920 = vrsqrt.f32 %v1275_v23  ;;  %v449_v35 = vmul.f32 %v1252_v10, %v448_v24  ;;  %vm414_vm9 = vweird.f32 %v1270_v20  ;;  %vm1391_vm4 = vmor %vm433_vm14, %vm434_vm15 }
  0xa9   : > { %v429_v27 = vmul.f32 %v1262_v15, %v428_v22  ;;  %v402_v48 = vmul.f32 %v1238_v1, %v401_v33  ;;  %922 = vrsqrt.f32 %v1297_v37  ;;  %vm415_vm0 = vmor %vm413_vm8, %vm414_vm9  ;;  %v446_v61 = vsel %vm1314_vm10, %v1226_v57, %v442_v44 }
  0xaa   : > { %v409_v31 = vmul.f32 %v1270_v20, %v408_v26  ;;  %v450_v51 = vmul.f32 0.5, %v449_v35  ;;  %v426_v63 = vsel %vm1326_vm11, %v1232_v62, %v422_v45  ;;  %v1379_v17 = vperm.slane %v446_v61, %v1255_v11 }
  0xab   : > { %v430_v34 = vmul.f32 0.5, %v429_v27  ;;  %v406_v57 = vsel %vm1358_vm1, %v1238_v1, %v402_v48  ;;  %v581_v1 = vperm.slane %v426_v63, %v1258_v12  ;;  %vm454_vm3 = vweird.f32 %v1252_v10 }
  0xac   : > { %v410_v36 = vmul.f32 0.5, %v409_v31  ;;  %v368_v38 = vpop.xlane.xlu2 %367  ;;  %v365_v39 = vpop.xlane.xlu1 %364  ;;  %v451_v54 = vsub.f32 1.5, %v450_v51  ;;  %v575_v22 = vperm.slane %v406_v57, %v1246_v4  ;;  %vm483_vm6 = vweird.f32 %v1260_v13  ;;  %vm1430_vm14 = vmor %vm453_vm13, %vm454_vm3 }
  0xad   : > { %v1299_v40 = vpop.eup %918  ;;  %v1303_v41 = vmax.f32 %v368_v38, 1e-24  ;;  %v1305_v42 = vmax.f32 %v365_v39, 1e-24  ;;  %v362_v43 = vpop.xlane.xlu0 %361  ;;  %v431_v49 = vsub.f32 1.5, %v430_v34  ;;  %vm473_vm8 = vweird.f32 %v1275_v23 }
  0xae   : > { %v411_v46 = vsub.f32 1.5, %v410_v36  ;;  %v478_v50 = vmul.f32 %v1299_v40, %v1260_v13  ;;  %v1335_v58 = vpop.eup %920  ;;  %v1370_v6 = vmax.f32 %v362_v43, 1e-24  ;;  %v452_v60 = vmul.f32 %v1252_v10, %v451_v54 }
  0xaf   : > { %924 = vrsqrt.f32 %v1303_v41  ;;  %v468_v3 = vmul.f32 %v1335_v58, %v1275_v23  ;;  %v432_v5 = vmul.f32 %v1262_v15, %v431_v49  ;;  %v1376_v16 = vpop.eup %922  ;;  %v1410_v33 = vadd.s32 4294967224, %v1246_v4 }
  0xb0   : > { %v412_v55 = vmul.f32 %v1270_v20, %v411_v46  ;;  %926 = vrsqrt.f32 %v1305_v42  ;;  %v479_v62 = vmul.f32 %v1299_v40, %v478_v50  ;;  %v458_v12 = vmul.f32 %v1376_v16, %v1297_v37 }
  0xb1   : > { %v469_v8 = vmul.f32 %v1335_v58, %v468_v3  ;;  %928 = vrsqrt.f32 %v1370_v6  ;;  %v436_v27 = vsel %vm1391_vm4, %v1262_v15, %v432_v5  ;;  %vm484_vm9 = vweird.f32 %v1299_v40 }
  0xb2   : > { %v416_v2 = vsel %vm415_vm0, %v1270_v20, %v412_v55  ;;  %v480_v29 = vmul.f32 0.5, %v479_v62  ;;  %v459_v31 = vmul.f32 %v1376_v16, %v458_v12  ;;  %v585_v38 = vperm.slane %v436_v27, %v1268_v19  ;;  %vm1484_vm4 = vmor %vm483_vm6, %vm484_vm9 }
  0xb3   : > { %v577_v7 = vperm.slane %v416_v2, %v576_v25  ;;  %v470_v11 = vmul.f32 0.5, %v469_v8  ;;  %vm594_vm10 = vcmask 392512   ;;  %vm598_vm11 = vcmask 458112  }
  0xb4   : > { %v377_v14 = vpop.xlane.xlu2 %376  ;;  %v374_v34 = vpop.xlane.xlu1 %373  ;;  %v460_v39 = vmul.f32 0.5, %v459_v31  ;;  %v481_v45 = vsub.f32 1.5, %v480_v29  ;;  %vm474_vm15 = vweird.f32 %v1335_v58  ;;  %vm464_vm0 = vweird.f32 %v1376_v16 }
  0xb5   : > { %v371_v20 = vpop.xlane.xlu0 %370  ;;  %v1384_v21 = vpop.eup %924  ;;  %v1397_v25 = vmax.f32 %v377_v14, 1e-24  ;;  %v579_v30 = vsel %vm578_vm7, %v577_v7, %v575_v22  ;;  %v471_v35 = vsub.f32 1.5, %v470_v11  ;;  %vm463_vm7 = vweird.f32 %v1297_v37 }
  0xb6   : > { %v1399_v26 = vpop.eup %926  ;;  %v508_v15 = vmul.f32 %v1384_v21, %v1303_v41  ;;  %v583_v44 = vsel %vm582_vm12, %v581_v1, %v579_v30  ;;  %v1424_v47 = vmax.f32 %v374_v34, 1e-24  ;;  %v461_v48 = vsub.f32 1.5, %v460_v39  ;;  %vm1452_vm13 = vmor %vm463_vm7, %vm464_vm0 }
  0xb7   : > { %v498_v36 = vmul.f32 %v1399_v26, %v1305_v42  ;;  %930 = vrsqrt.f32 %v1397_v25  ;;  %v1420_v43 = vpop.eup %928  ;;  %v472_v50 = vmul.f32 %v1335_v58, %v471_v35  ;;  %v587_v55 = vsel %vm586_vm2, %v585_v38, %v583_v44  ;;  %vm1465_vm2 = vmor %vm473_vm8, %vm474_vm15 }
  0xb8   : > { %v488_v49 = vmul.f32 %v1420_v43, %v1370_v6  ;;  %v509_v53 = vmul.f32 %v1384_v21, %v508_v15  ;;  %932 = vrsqrt.f32 %v1424_v47  ;;  %vm602_vm12 = vcmask 523712  }
  0xb9   : > { %v499_v46 = vmul.f32 %v1399_v26, %v498_v36  ;;  %v462_v61 = vmul.f32 %v1376_v16, %v461_v48  ;;  %v1444_v0 = vmax.f32 %v371_v20, 1e-24  ;;  %v456_v2 = vsel %vm1430_vm14, %v1252_v10, %v452_v60 }
  0xba   : > { %v489_v63 = vmul.f32 %v1420_v43, %v488_v49  ;;  %v482_v3 = vmul.f32 %v1299_v40, %v481_v45  ;;  %vm493_vm1 = vweird.f32 %v1370_v6  ;;  %v476_v8 = vsel %vm1465_vm2, %v1335_v58, %v472_v50 }
  0xbb   : > { %v500_v51 = vmul.f32 0.5, %v499_v46  ;;  %v466_v37 = vsel %vm1452_vm13, %v1376_v16, %v462_v61  ;;  %934 = vrsqrt.f32 %v1444_v0  ;;  %v591_v14 = vsel %vm590_vm5, %v1379_v17, %v587_v55 }
  0xbc   : > { %v490_v7 = vmul.f32 0.5, %v489_v63  ;;  %v510_v23 = vmul.f32 0.5, %v509_v53  ;;  %vm606_vm3 = vcmask 589312   ;;  %v597_v20 = vperm.slane %v466_v37, %v1332_v56 }
  0xbd   : > { %v380_v59 = vpop.xlane.xlu0 %379  ;;  %v1459_v62 = vpop.eup %930  ;;  %v501_v54 = vsub.f32 1.5, %v500_v51  ;;  %vm494_vm8 = vweird.f32 %v1420_v43  ;;  %v593_v17 = vperm.slane %v456_v2, %v1265_v18  ;;  %vm513_vm5 = vweird.f32 %v1303_v41 }
  0xbe   : > { %v1457_v5 = vmax.f32 %v380_v59, 1e-24  ;;  %v538_v1 = vmul.f32 %v1459_v62, %v1397_v25  ;;  %v491_v22 = vsub.f32 1.5, %v490_v7  ;;  %v1491_v58 = vpop.eup %932  ;;  %vm503_vm7 = vweird.f32 %v1305_v42  ;;  %vm1511_vm14 = vmor %vm493_vm1, %vm494_vm8 }
  0xbf   : > { %vm504_vm6 = vweird.f32 %v1399_v26  ;;  %v502_v13 = vmul.f32 %v1399_v26, %v501_v54  ;;  %v528_v11 = vmul.f32 %v1491_v58, %v1424_v47  ;;  %v486_v12 = vsel %vm1484_vm4, %v1299_v40, %v482_v3 }
  0xc0   : > { %936 = vrsqrt.f32 %v1457_v5  ;;  %v492_v24 = vmul.f32 %v1420_v43, %v491_v22  ;;  %v539_v56 = vmul.f32 %v1459_v62, %v538_v1  ;;  %v601_v18 = vperm.slane %v476_v8, %v1291_v32  ;;  %vm1525_vm15 = vmor %vm503_vm7, %vm504_vm6 }
  0xc1   : > { %v595_v27 = vsel %vm594_vm10, %v593_v17, %v591_v14  ;;  %vm610_vm9 = vcmask 654912   ;;  %v935_v60 = vpop.eup %934  ;;  %v511_v31 = vsub.f32 1.5, %v510_v23  ;;  %v529_v32 = vmul.f32 %v1491_v58, %v528_v11 }
  0xc2   : > { %v599_v30 = vsel %vm598_vm11, %v597_v20, %v595_v27  ;;  %v496_v40 = vsel %vm1511_vm14, %v1420_v43, %v492_v24  ;;  %vm514_vm10 = vweird.f32 %v1384_v21  ;;  %v624_v34 = vadd.s32 4294967192, %v1246_v4 }
  0xc3   : > { %v620_v35 = vadd.s32 4294967200, %v1246_v4  ;;  %v518_v15 = vmul.f32 %v935_v60, %v1444_v0  ;;  %v605_v38 = vperm.slane %v486_v12, %v1287_v28  ;;  %v506_v39 = vsel %vm1525_vm15, %v1399_v26, %v502_v13  ;;  %vm1545_vm13 = vmor %vm513_vm5, %vm514_vm10 }
  0xc4   : > { %v540_v43 = vmul.f32 0.5, %v539_v56  ;;  %v530_v44 = vmul.f32 0.5, %v529_v32  ;;  %v603_v42 = vsel %vm602_vm12, %v601_v18, %v599_v30  ;;  %v609_v45 = vperm.slane %v496_v40, %v1410_v33 }
  0xc5   : > { %v519_v46 = vmul.f32 %v935_v60, %v518_v15  ;;  %v512_v48 = vmul.f32 %v1384_v21, %v511_v31  ;;  %vm533_vm11 = vweird.f32 %v1424_v47  ;;  %vm614_vm0 = vcmask 720512  }
  0xc6   : > { %v937_v36 = vpop.eup %936  ;;  %v531_v49 = vsub.f32 1.5, %v530_v44  ;;  %vm534_vm12 = vweird.f32 %v1491_v58  ;;  %vm523_vm1 = vweird.f32 %v1444_v0  ;;  %v613_v50 = vperm.slane %v506_v39, %v1374_v9 }
  0xc7   : > { %v548_v19 = vmul.f32 %v937_v36, %v1457_v5  ;;  %v520_v26 = vmul.f32 0.5, %v519_v46  ;;  %v607_v53 = vsel %vm606_vm3, %v605_v38, %v603_v42  ;;  %v541_v51 = vsub.f32 1.5, %v540_v43  ;;  %vm535_vm3 = vmor %vm533_vm11, %vm534_vm12 }
  0xc8   : > { %v532_v59 = vmul.f32 %v1491_v58, %v531_v49  ;;  %v611_v55 = vsel %vm610_vm9, %v609_v45, %v607_v53  ;;  %vm524_vm2 = vweird.f32 %v935_v60  ;;  %v516_v63 = vsel %vm1545_vm13, %v1384_v21, %v512_v48 }
  0xc9   : > { %v549_v33 = vmul.f32 %v937_v36, %v548_v19  ;;  %v521_v41 = vsub.f32 1.5, %v520_v26  ;;  %vm543_vm4 = vweird.f32 %v1397_v25  ;;  %vm544_vm8 = vweird.f32 %v1459_v62  ;;  %vm525_vm6 = vmor %vm523_vm1, %vm524_vm2 }
  0xca   : > { %vm553_vm5 = vweird.f32 %v1457_v5  ;;  %v536_v9 = vsel %vm535_vm3, %v1491_v58, %v532_v59  ;;  %vm554_vm7 = vweird.f32 %v937_v36  ;;  %v542_v57 = vmul.f32 %v1459_v62, %v541_v51  ;;  %vm1571_vm14 = vmor %vm543_vm4, %vm544_vm8 }
  0xcb   : > { %v550_v61 = vmul.f32 0.5, %v549_v33  ;;  %v522_v2 = vmul.f32 %v935_v60, %v521_v41  ;;  %v615_v21 = vsel %vm614_vm0, %v613_v50, %v611_v55  ;;  %vm618_vm9 = vcmask 786112   ;;  %vm555_vm15 = vmor %vm553_vm5, %vm554_vm7 }
  0xcc   : > { %v617_v25 = vperm.slane %v516_v63, %v1345_v52  ;;  %vm622_vm10 = vcmask 851712   ;;  %v625_v54 = vperm.slane %v536_v9, %v624_v34  ;;  %v632_v0 = vadd.s32 4294967176, %v1246_v4 }
  0xcd   : > { %v551_v3 = vsub.f32 1.5, %v550_v61  ;;  %v526_v10 = vsel %vm525_vm6, %v935_v60, %v522_v2  ;;  %vm626_vm11 = vcmask 917312   ;;  %v628_v52 = vadd.s32 4294967184, %v1246_v4 }
  0xce   : > { %v621_v7 = vperm.slane %v526_v10, %v620_v35  ;;  %v619_v14 = vsel %vm618_vm9, %v617_v25, %v615_v21  ;;  %v546_v23 = vsel %vm1571_vm14, %v1459_v62, %v542_v57  ;;  %vm630_vm0 = vcmask 982912  }
  0xcf   : > { %v552_v37 = vmul.f32 %v937_v36, %v551_v3  ;;  %v629_v5 = vperm.slane %v546_v23, %v628_v52  ;;  %vm634_vm13 = vcmask 1048512  }
  0xd0   : > { %v623_v1 = vsel %vm622_vm10, %v621_v7, %v619_v14 }
  0xd1   : > { %v556_v8 = vsel %vm555_vm15, %v937_v36, %v552_v37  ;;  %v627_v16 = vsel %vm626_vm11, %v625_v54, %v623_v1 }
  0xd2   : > { %v633_v20 = vperm.slane %v556_v8, %v632_v0  ;;  %v631_v22 = vsel %vm630_vm0, %v629_v5, %v627_v16 }
  0xd4   : > { %v635_v17 = vsel %vm634_vm13, %v633_v20, %v631_v22 }
  0xd9   : > { %656 = sbr.rel (%p841_p12) target bundleno = 502 (0x1f6), region = 36 }
  0xda   : > { %v314_v58 = vpop.f32.mrf.mxu0 }
  0xdb   : > { %v649_v13 = vmul.f32 %v635_v17, %v314_v58 }
  0xdd   : > { %650 = vst [vmem:[%s1585_s16] sm:$0xff] %v649_v13 }
  0xde   : > { %v661_v62 = vld [vmem:[%s1636_s1] sm:$0xff]  ;;  %v1036_v24 = vmov 0   ;;  %v659_v56 = vstv %s842_s0  ;;  %v1037_v27 = vmov 0.0  }
  0xdf   : > { %938 = vset.pattern.permute.xlu0 %v1036_v24  ;;  %v660_v11 = vadd.s32 %v659_v56, %v1246_v4 }
  0xe0   : > { %663 = vperm.xlu0 %938, %v661_v62  }
  0xe4   : > { %v657_v18 = vld [vmem:[%s1585_s16] sm:$0xff] }
 0x152   : > { %v664_v12 = vpop.permute.xlu0 %663 }
 0x153   : > { %vm665_vm12 = vcmp.eq.s32.totalorder %v660_v11, %v664_v12 }
 0x154   : > { %v843_v29 = vsel %vm665_vm12, 1.0, %v1037_v27 }
 0x155   : > { %v668_v60 = vmul.f32 %v843_v29, %v657_v18 }
 0x157   : > { %669 = vadd.xlane.f32.xlu0 %v668_v60 }
 0x1ca   : > { %v670_v30 = vpop.xlane.xlu0 %669 }
 0x1cb   : > { %v671_v31 = vmul.f32 0.015625, %v670_v30  ;;  %vm691_vm4 = vcmp.gt.f32.partialorder %v670_v30, 0.0 }
 0x1cd   : > { %v672_v40 = vmul.f32 %v671_v31, %v671_v31  ;;  %v687_v45 = vmul.f32 0.87758255, %v671_v31 }
 0x1cf   : > { %v673_v32 = vsub.f32 1.0, %v672_v40 }
 0x1d1   : > { %v674_v6 = vmax.f32 %v673_v32, 0.0 }
 0x1d3   : > { %939 = vrsqrt.f32 %v674_v6  ;;  %vm682_vm1 = vcmp.eq.f32.partialorder %v674_v6, inf  ;;  %v685_v43 = vand.u32 2147483648, %v674_v6  ;;  %vm684_vm2 = vcmp.eq.f32.partialorder %v674_v6, 0.0 }
 0x1d9   : > { %v940_v34 = vpop.eup %939 }
 0x1da   : > { %v676_v35 = vmul.f32 %v940_v34, %v674_v6 }
 0x1dc   : > { %v677_v15 = vmul.f32 %v940_v34, %v676_v35 }
 0x1de   : > { %v678_v36 = vmul.f32 0.5, %v677_v15 }
 0x1e0   : > { %v679_v38 = vsub.f32 1.5, %v678_v36 }
 0x1e2   : > { %v680_v39 = vmul.f32 %v940_v34, %v679_v38 }
 0x1e4   : > { %v681_v4 = vmul.f32 %v680_v39, %v674_v6 }
 0x1e6   : > { %v683_v44 = vsel %vm682_vm1, %v674_v6, %v681_v4 }
 0x1e7   : > { %v686_v42 = vsel %vm684_vm2, %v685_v43, %v683_v44 }
 0x1e8   : > { %v688_v46 = vmul.f32 0.47942555, %v686_v42 }
 0x1ea   : > { %v689_v19 = vsub.f32 %v687_v45, %v688_v46 }
 0x1ec   : > { %v690_v48 = vmul.f32 64.0, %v689_v19 }
 0x1ee   : > { %v692_v49 = vsel %vm691_vm4, %v690_v48, %v670_v30 }
 0x1ef   : > { %v693_v28 = vsub.f32 %v692_v49, %v670_v30 }
 0x1f1   : > { %v694_v26 = vmul.f32 %v843_v29, %v693_v28 }
 0x1f3   : > { %v695_v33 = vadd.f32 %v694_v26, %v657_v18 }
 0x1f5   : > { %696 = vst [vmem:[%s1585_s16] sm:$0xff] %v695_v33 }
 0x1f6 PF: > { %s845_s25 = sshll.u32 %s1025_s22, 3  ;;  %s712_s7 = sshll.u32 %s1585_s16, 4  ;;  %s713_s7 = int_to_ptr.vmem [resolvable:$true] %s712_s7 }
 0x1f7   : > { %s710_s6 = scalar_lea.hbm %s1639_s4, %s845_s25  ;;  %s698_s9 = scalar_lea.sflag [#allocation5], %s211_s14 }
 0x1f8   : > { %s714_s8 = sshll.u32 %s710_s6, 4  ;;  %s973_s22 = scalar_lea.hbm %s1639_s4, 16  ;;  %s715_s8 = int_to_ptr.hbm [resolvable:$true] %s714_s8 }
 0x1f9   : > { %s967_s10 = sshra.s32 %s715_s8, 4  ;;  %s968_s10 = int_to_ptr.hbm [resolvable:$true] %s967_s10 }
 0x1fa   : > { %s969_s11 = scalar_lea.hbm %s968_s10, 8  ;;  %p974_p2 = scmp.lt.s32.totalorder %s968_s10, %s1639_s4 }
 0x1fb   : > { %p970_p13 = scmp.ne.s32.totalorder %s968_s10, %s969_s11  ;;  %p975_p3 = scmp.lt.s32.totalorder %s973_s22, %s969_s11 }
 0x1fd   : > { %p971_p0 = pnand %p970_p13, %p1106_p4  ;;  %p976_p5 = por %p975_p3, %p974_p2 }
 0x1ff   : > { %p972_p1 = pneg %p971_p0 }
 0x201   : > { %p977_p6 = pnand %p976_p5, %p972_p1 }
 0x203   : > { %980 = shalt.err (!%p977_p6)
}
 0x204   : > { %848 = dma.vmem_to_hbm [thread:$0]  (%p1106_p4), %s713_s7, 128, %s715_s8, %s698_s9  }
 0x205 PF: > { %p854_p7 = scmp.ge.s32.totalorder %s1033_s24, 2  ;;  %s726_s14 = sand.u32 1, %s1013_s19  }
 0x206   : > { %s727_s16 = scalar_lea.sflag [#allocation5], %s726_s14 }
 0x207   : > { %p851_p9 = pnand %p854_p7, %p1113_p8 }
 0x209   : > { %p852_p10 = pneg %p851_p9 }
 0x20b   : > { %1008 = dma.done.wait (%p852_p10), %s727_s16, 128  }
 0x20c   : > { %1010 = vsyncadd (%p852_p10), %s727_s16, 4294967168  ;;  %s25_s24 = sadd.s32 1, %s1033_s24   ;;  %s1666_s19 = smov %s1017_s20 }
 0x20d   : > { %p22_p11 = scmp.ge.s32.totalorder %s25_s24, 4   ;;  %s1667_s20 = smov %s1021_s21 }
 0x20e   : > { %s1668_s21 = smov %s1119_s5  ;;  %s1669_s22 = smov %s1029_s23 }
 0x20f   : > { %s1670_s23 = smov %s1672_s26  ;;  %24 = sbr.rel (!%p22_p11) target bundleno = 10 (0xa), region = 77 }
 0x214   :  { %733 = vsyncpa [#allocation5], 1 }
 0x215   :  { %735 = vsyncpa [#allocation5 + $0x1], 1 }

</bundles_post_ra>
